<compile_context>
chip_gen: v6e
topology: v6e:2x2x1
jax: 0.10.0
libtpu: 0.0.40
codegen_flags: <defaults>
</compile_context>

<pallas_src>
import jax
import jax.numpy as jnp
from jax.experimental import pallas as pl
from jax.experimental.pallas import tpu as pltpu


def _affine_kernel(x_ref, scale_ref, bias_ref, o_ref):
    """Fused (ToTensor + normalize + per_batch affine), constant-folded.

    x_ref     : (TR, TC) uint8   raw pixel values in [0, 255]
    scale_ref : (TR, 1)  float32 per-row (= per-channel) folded scale
    bias_ref  : (TR, 1)  float32 per-row folded bias
    o_ref     : (TR, TC) out dtype
    """
    x = x_ref[...].astype(jnp.float32)
    o_ref[...] = (x * scale_ref[...] + bias_ref[...]).astype(o_ref.dtype)


def _vmem_limit_bytes():
    """Generation-aware scoped-VMEM budget (~75% of per-core physical VMEM)."""
    try:
        cap = int(pltpu.get_tpu_info().vmem_capacity_bytes)
    except Exception:  # conservative (v7x-sized) fallback
        cap = 64 * 1024 * 1024
    # ~96 MiB on v5e/v6e (128 MiB physical), ~48 MiB on v7x (64 MiB physical).
    return min(cap * 3 // 4, 100 * 1024 * 1024)


def _pick_tiles(NC, HW, out_itemsize, vmem_limit_bytes):
    """Largest legal (rows, cols) tile whose double-buffered footprint stays
    inside ~65% of the VMEM limit.  Remainders are handled by a cdiv grid
    (Pallas masks the partial blocks), so no full-dimension fallback exists."""
    LANE, SUBLANE = 128, 32            # uint8 native VMEM tiling is (32, 128)
    MAX_ROWS = 2048                    # keeps (rows,1) param lane-padding tiny
    bpe = 2 * (1 + out_itemsize)       # dbl-buffered u8 in + out, per element
    budget = max(int(vmem_limit_bytes * 0.65), SUBLANE * LANE * bpe)

    # Rows: cover all of NC whenever a full 128-lane column strip still fits
    # (the per-row params are then fetched once); else largest 32-aligned tile.
    if NC <= SUBLANE:
        block_rows = NC                                   # full-extent (legal)
    elif NC <= MAX_ROWS and NC * LANE * bpe <= budget:
        block_rows = NC                                   # full-extent (legal)
    else:
        block_rows = max(
            min(budget // (LANE * bpe), NC, MAX_ROWS) // SUBLANE * SUBLANE,
            SUBLANE)

    # Columns: as wide as the remaining budget allows (lane-dense stores).
    cols_budget = max(budget // (block_rows * bpe), LANE)
    if cols_budget >= HW:
        block_cols = HW                                   # full-extent (legal)
    else:
        block_cols = max(cols_budget // LANE * LANE, LANE)

    # Guarantee >=2 grid blocks so both v7x TensorCores get work (megacore).
    if pl.cdiv(NC, block_rows) * pl.cdiv(HW, block_cols) < 2:
        if HW > LANE:
            block_cols = max(((HW + 1) // 2) // LANE * LANE, LANE)
        elif NC > SUBLANE:
            block_rows = max(((NC + 1) // 2) // SUBLANE * SUBLANE, SUBLANE)

    return block_rows, block_cols


def preprocessor_batch_forward(batch_u8, mean, std, gamma, beta,
                               out_dtype=jnp.float32):
    """Hot path: fused elementwise chain on an already-collated uint8 NCHW batch."""
    N, C, H, W = batch_u8.shape
    NC, HW = N * C, H * W

    # --- constant-fold the whole transform chain (C-length math, wrapper-side) ---
    # NOTE: folding changes FP association slightly vs. the unfused PyTorch chain
    # (well within 1e-5 of the f32 reference).
    mean = mean.astype(jnp.float32)
    std = std.astype(jnp.float32)
    gamma = gamma.astype(jnp.float32)
    beta = beta.astype(jnp.float32)
    scale_c = gamma / (255.0 * std)
    bias_c = beta - mean * gamma / std

    # Per-row parameters (row = n*C + c  ->  channel = row % C), shape (NC, 1).
    scale_r = jnp.tile(scale_c, (N,)).reshape(NC, 1)
    bias_r = jnp.tile(bias_c, (N,)).reshape(NC, 1)

    # Lane-dense 2-D view; contiguous reshape => no HBM copy, no dtype change.
    x2d = batch_u8.reshape(NC, HW)

    out_itemsize = jnp.dtype(out_dtype).itemsize
    vmem_limit = _vmem_limit_bytes()
    block_rows, block_cols = _pick_tiles(NC, HW, out_itemsize, vmem_limit)
    grid = (pl.cdiv(NC, block_rows), pl.cdiv(HW, block_cols))  # j (cols) innermost

    x_spec = pl.BlockSpec((block_rows, block_cols), lambda i, j: (i, j))
    p_spec = pl.BlockSpec((block_rows, 1), lambda i, j: (i, 0))
    o_spec = pl.BlockSpec((block_rows, block_cols), lambda i, j: (i, j))

    cost = pl.CostEstimate(
        flops=2 * NC * HW,                       # one mul + one add per element
        transcendentals=0,
        bytes_accessed=NC * HW * 1               # uint8 read
        + NC * HW * out_itemsize                 # output write
        + 2 * NC * 4,                            # scale/bias reads
    )

    out2d = pl.pallas_call(
        _affine_kernel,
        out_shape=jax.ShapeDtypeStruct((NC, HW), out_dtype),
        grid=grid,
        in_specs=[x_spec, p_spec, p_spec],
        out_specs=o_spec,
        compiler_params=pltpu.CompilerParams(
            dimension_semantics=("parallel", "parallel"),  # megacore on v7x
            vmem_limit_bytes=vmem_limit,
        ),
        cost_estimate=cost,
    )(x2d, scale_r, bias_r)

    return out2d.reshape(N, C, H, W)


def preprocessor_forward(samples, mean, std, gamma, beta, out_dtype=jnp.float32):
    """Mirror of _PreProcessor.forward for a list of (C, H, W) uint8 samples.

    pre_tensor_transform is identity (commutes with stacking), so the collate
    (default_collate == stack) runs first in the narrow uint8 dtype, and all
    per-element math is fused in a single Pallas kernel on the collated batch.
    """
    batch_u8 = jnp.stack(samples, axis=0)  # collate_fn, 1 byte/pixel
    return preprocessor_batch_forward(batch_u8, mean, std, gamma, beta,
                                      out_dtype=out_dtype)


if __name__ == "__main__":
    # Small shapes consistent with image samples: N=2 samples, C=4, H=W=16.
    N, C, H, W = 2, 4, 16, 16
    key = jax.random.PRNGKey(0)
    keys = jax.random.split(key, N)

    # Raw uint8 "pixel" samples (the realistic ToTensor case), NCHW per sample.
    samples = [
        jax.random.randint(k, (C, H, W), 0, 256, dtype=jnp.int32).astype(jnp.uint8)
        for k in keys
    ]

    # Deterministic per-channel parameters (synthetic, not a checkpoint load).
    mean = jnp.linspace(0.40, 0.55, C, dtype=jnp.float32)
    std = jnp.linspace(0.20, 0.30, C, dtype=jnp.float32)
    gamma = jnp.linspace(0.9, 1.1, C, dtype=jnp.float32)
    beta = jnp.linspace(-0.1, 0.1, C, dtype=jnp.float32)

    out = preprocessor_forward(samples, mean, std, gamma, beta)
    out = jax.block_until_ready(out)

    # Pure-JAX reference of the un-folded chain.
    ref = jnp.stack(samples, axis=0).astype(jnp.float32) / 255.0
    ref = (ref - mean[None, :, None, None]) / std[None, :, None, None]
    ref = ref * gamma[None, :, None, None] + beta[None, :, None, None]

    assert out.shape == (N, C, H, W)
    assert jnp.allclose(out, ref, atol=1e-5, rtol=1e-5), float(
        jnp.max(jnp.abs(out - ref))
    )

    # Low-HBM-traffic output path: math in f32, cast only at the store.
    out_bf16 = preprocessor_forward(samples, mean, std, gamma, beta,
                                    out_dtype=jnp.bfloat16)
    out_bf16 = jax.block_until_ready(out_bf16)
    assert out_bf16.dtype == jnp.bfloat16
    assert jnp.allclose(out_bf16.astype(jnp.float32), ref, atol=0.1, rtol=0.02)

    print("KERNEL_OK")
</pallas_src>

<mosaic_0001>
module attributes {stable_mosaic.version = 11 : i64} {
  func.func @_affine_kernel(%arg0: i32, %arg1: i32, %arg2: memref<8x128xi8, #tpu.memory_space<vmem>>, %arg3: memref<8x1xf32, #tpu.memory_space<vmem>>, %arg4: memref<8x1xf32, #tpu.memory_space<vmem>>, %arg5: memref<8x128xf32, #tpu.memory_space<vmem>>) attributes {dimension_semantics = [#tpu.dimension_semantics<parallel>, #tpu.dimension_semantics<parallel>], iteration_bounds = array<i64: 1, 2>, scalar_prefetch = 0 : i64, scratch_operands = 0 : i64, tpu.core_type = #tpu.core_type<tc>, window_params = [{transform_indices = @transform_0, window_bounds = array<i64: 8, 128>}, {transform_indices = @transform_1, window_bounds = array<i64: 8, 1>}, {transform_indices = @transform_2, window_bounds = array<i64: 8, 1>}, {transform_indices = @transform_3, window_bounds = array<i64: 8, 128>}]} {
    %c0 = arith.constant 0 : index
    %c0_0 = arith.constant 0 : index
    %0 = vector.load %arg2[%c0, %c0_0] : memref<8x128xi8, #tpu.memory_space<vmem>>, vector<8x128xi8>
    %1 = arith.uitofp %0 : vector<8x128xi8> to vector<8x128xf32>
    %c0_1 = arith.constant 0 : index
    %c0_2 = arith.constant 0 : index
    %2 = vector.load %arg3[%c0_1, %c0_2] : memref<8x1xf32, #tpu.memory_space<vmem>>, vector<8x1xf32>
    %3 = vector.broadcast %2 : vector<8x1xf32> to vector<8x128xf32>
    %4 = arith.mulf %1, %3 : vector<8x128xf32>
    %c0_3 = arith.constant 0 : index
    %c0_4 = arith.constant 0 : index
    %5 = vector.load %arg4[%c0_3, %c0_4] : memref<8x1xf32, #tpu.memory_space<vmem>>, vector<8x1xf32>
    %6 = vector.broadcast %5 : vector<8x1xf32> to vector<8x128xf32>
    %7 = arith.addf %4, %6 : vector<8x128xf32>
    %c0_5 = arith.constant 0 : index
    %c0_6 = arith.constant 0 : index
    %8 = vector.load %arg5[%c0_5, %c0_6] : memref<8x128xf32, #tpu.memory_space<vmem>>, vector<8x128xf32>
    tpu.vector_store %arg5[%c0_5, %c0_6], %7 {strides = array<i32>} : memref<8x128xf32, #tpu.memory_space<vmem>>, vector<8x128xf32>,
    return
  }
  func.func @transform_0(%arg0: i32, %arg1: i32) -> (i32, i32) {
    %c0_i32 = arith.constant 0 : i32
    return %arg0, %arg1 : i32, i32
  }
  func.func @transform_1(%arg0: i32, %arg1: i32) -> (i32, i32) {
    %c0_i32 = arith.constant 0 : i32
    %c0_i32_0 = arith.constant 0 : i32
    return %arg0, %c0_i32 : i32, i32
  }
  func.func @transform_2(%arg0: i32, %arg1: i32) -> (i32, i32) {
    %c0_i32 = arith.constant 0 : i32
    %c0_i32_0 = arith.constant 0 : i32
    return %arg0, %c0_i32 : i32, i32
  }
  func.func @transform_3(%arg0: i32, %arg1: i32) -> (i32, i32) {
    %c0_i32 = arith.constant 0 : i32
    return %arg0, %arg1 : i32, i32
  }
}

</mosaic_0001>

<bundles_post_ra>
// kernel: tpu_custom_call.1
= control target key start
LH: loop header
LB: loop body
LE: loop exit
PB: predicated region body
PF: predicated region fallthrough
CT: control target
= control target key end

     0   :  { %8 = vsyncpa [#allocation3], 0  ;;  %s643_s0 = inlined_call_operand.vmem [shape: u8[8,256], index: 0, kind: input, shape index: {}]   ;;  %s644_s1 = inlined_call_operand.vmem [shape: f32[8,1], index: 1, kind: input, shape index: {}]   ;;  %s645_s2 = inlined_call_operand.vmem [shape: f32[8,1], index: 2, kind: input, shape index: {}]   ;;  %s646_s3 = inlined_call_operand.hbm [shape: f32[8,256], index: 3, kind: output, shape index: {}]  }
   0x1   :  { %10 = vsyncpa [#allocation3 + $0x1], 0  ;;  %s538_s12 = smov 0   ;;  %s540_s13 = smov 0  }
   0x2   :  { %s542_s14 = smov 0   ;;  %s544_s15 = smov 0  }
   0x3   :  { %s546_s16 = smov 0   ;;  %s548_s17 = smov 0  }
   0x4 LB: > { %s368_s18 = sadd.s32 4294967295, %s514_s17   ;;  %s369_s19 = sadd.s32 4294967294, %s514_s17   ;;  %s514_s17 = sphi %s548_s17, %s16_s17   ;;  %s510_s16 = sphi %s546_s16, %s653_s16   ;;  %s506_s15 = sphi %s544_s15, %s652_s15   ;;  %s502_s14 = sphi %s542_s14, %s651_s14   ;;  %s498_s13 = sphi %s540_s13, %s650_s13   ;;  %s494_s12 = sphi %s538_s12, %s649_s12  }
   0x5   : > { %s25_s20 = sadd.s32 1, %s510_s16  ;;  %s117_s21 = sadd.s32 1, %s502_s14 }
   0x6   : > { %p26_p0 = scmp.ge.s32.totalorder %s25_s20, 2  ;;  %p127_p1 = scmp.ne.s32.totalorder %s502_s14, %s498_s13 }
   0x7   : > { %p128_p2 = scmp.eq.s32.totalorder %s368_s18, 1  ;;  %p133_p3 = scmp.ne.s32.totalorder %s498_s13, %s494_s12 }
   0x8   : > { %s655_s20 = smov (%p26_p0, %s25_s20), 0  ;;  %p134_p5 = scmp.eq.s32.totalorder %s369_s19, 1 }
   0x9   : > { %p578_p4 = por %p128_p2, %p127_p1  ;;  %s113_s23 = ssub.s32 %s510_s16, %s655_s20 }
   0xa   : > { %p374_p6 = scmp.ge.s32.totalorder %s514_s17, 1  ;;  %p115_p7 = scmp.eq.s32.totalorder %s113_s23, 0 }
   0xb   : > { %p585_p8 = por %p134_p5, %p133_p3  ;;  %p177_p9 = scmp.lt.s32.totalorder %s514_s17, 3 }
   0xc   : > { %s591_s25 = scalar_select %p115_p7, %s502_s14, %s117_s21  }
   0xd   : > { %p178_p10 = pnand %p374_p6, %p177_p9 }
   0xe   : > { %p214_p11 = scmp.lt.s32.totalorder (!%p178_p10), %s506_s15, 1  ;;  %s209_s8 = sand.u32 (!%p178_p10), 1, %s498_s13  }
   0xf   : > { %181 = sbr.rel (%p178_p10) target bundleno = 165 (0xa5), region = 32  ;;  %s375_s9 = sshll.u32 (!%p178_p10), %s209_s8, 3 }
  0x10   : > { %s378_s10 = sshll.u32 (!%p178_p10), %s506_s15, 7  ;;  %s211_s11 = scalar_lea.vmem (!%p178_p10), [#allocation2], %s375_s9 }
  0x11   : > { %s263_s18 = sshll.u32 (!%p178_p10), %s211_s11, 4  ;;  %s261_s23 = scalar_lea.hbm (!%p178_p10), %s646_s3, %s378_s10  ;;  %s264_s18 = int_to_ptr.vmem [resolvable:$true] %s263_s18 }
  0x12   : > { %s248_s26 = scalar_lea.sflag (!%p178_p10), [#allocation3], %s209_s8  ;;  %s438_s27 = scalar_lea.vmem (!%p178_p10), %s264_s18, 128 }
  0x13   : > { %p439_p12 = scmp.ne.s32.totalorder (!%p178_p10), %s264_s18, %s438_s27  ;;  %s517_s28 = smov (!%p178_p10), [#allocation2]  }
  0x14   : > { %v232_v0 = vld [vmem:[%s644_s1] sm:$0xff]  ;;  %v516_v1 = vmov 0   ;;  %s215_s30 = scalar_select %p214_p11, %s506_s15, 1 }
  0x15   : > { %437 = vset.pattern.permute.xlu0 %v516_v1  ;;  %v239_v2 = vld [vmem:[%s645_s2] sm:$0xff]  ;;  %p440_p13 = pnand %p439_p12, %p578_p4  ;;  %s442_s29 = sshll.u32 %s517_s28, 4  ;;  %s443_s29 = int_to_ptr.vmem [resolvable:$false] %s442_s29 }
  0x16   : > { %235 = vperm.xlu0 %437, %v232_v0   ;;  %s376_s4 = sshll.u32 %s215_s30, 1  ;;  %s444_s15 = scalar_lea.vmem %s443_s29, 256 }
  0x17   : > { %s219_s7 = scalar_lea.vmem %s643_s0, %s376_s4  ;;  %p441_p0 = pneg %p440_p13 }
  0x18   : > { %v228_v3 = vld [vmem:[%s219_s7] sm:$0x3]  ;;  %p445_p1 = scmp.lt.s32.totalorder %s264_s18, %s443_s29  ;;  %p446_p2 = scmp.lt.s32.totalorder %s444_s15, %s438_s27 }
  0x19   : > { %v229_v4 = vunpack.c.0.s8 %v228_v3 }
  0x1a   : > { %242 = vperm.xlu0 %437, %v239_v2   ;;  %p447_p3 = por %p446_p2, %p445_p1 }
  0x1b   : > { %v230_v5 = vand.u32 255, %v229_v4 }
  0x1c   : > { %p448_p5 = pnand %p447_p3, %p441_p0 }
  0x1d   : > { %v231_v6 = vcvt.s32.f32 %v230_v5 }
  0x91   : > { %v236_v7 = vpop.permute.xlu0 %235 }
  0x92   : > { %v238_v8 = vmul.f32 %v236_v7, %v231_v6 }
  0x95   : > { %v243_v9 = vpop.permute.xlu0 %242 }
  0x96   : > { %v245_v10 = vadd.f32 %v243_v9, %v238_v8 }
  0x98   : > { %246 = vst [vmem:[%s211_s11] sm:$0xff] %v245_v10 }
  0x99   : > { %451 = shalt.err (!%p448_p5)
}
  0x9a   : > { %s452_s30 = scalar_lea.hbm %s261_s23, 128  ;;  %s456_s6 = scalar_lea.hbm %s646_s3, 256 }
  0x9b   : > { %p453_p6 = scmp.ne.s32.totalorder %s261_s23, %s452_s30  ;;  %p457_p10 = scmp.lt.s32.totalorder %s261_s23, %s646_s3 }
  0x9c   : > { %p458_p11 = scmp.lt.s32.totalorder %s456_s6, %s452_s30 }
  0x9d   : > { %p454_p7 = pnand %p453_p6, %p578_p4 }
  0x9e   : > { %p459_p12 = por %p458_p11, %p457_p10 }
  0x9f   : > { %p455_p9 = pneg %p454_p7 }
  0xa1   : > { %p460_p13 = pnand %p459_p12, %p455_p9 }
  0xa3   : > { %463 = shalt.err (!%p460_p13)
}
  0xa4   : > { %381 = dma.vmem_to_hbm [thread:$0]  (%p578_p4), %s264_s18, 128, %s261_s23, %s248_s26  }
  0xa5 PF: > { %p387_p0 = scmp.ge.s32.totalorder %s514_s17, 2  ;;  %s275_s9 = sand.u32 1, %s494_s12  }
  0xa6   : > { %s276_s10 = scalar_lea.sflag [#allocation3], %s275_s9 }
  0xa7   : > { %p384_p1 = pnand %p387_p0, %p585_p8 }
  0xa9   : > { %p385_p2 = pneg %p384_p1 }
  0xab   : > { %489 = dma.done.wait (%p385_p2), %s276_s10, 128  }
  0xac   : > { %491 = vsyncadd (%p385_p2), %s276_s10, 4294967168  ;;  %s16_s17 = sadd.s32 1, %s514_s17   ;;  %s649_s12 = smov %s498_s13 }
  0xad   : > { %p13_p3 = scmp.ge.s32.totalorder %s16_s17, 4   ;;  %s650_s13 = smov %s502_s14 }
  0xae   : > { %s651_s14 = smov %s591_s25  ;;  %s652_s15 = smov %s510_s16 }
  0xaf   : > { %s653_s16 = smov %s655_s20  ;;  %15 = sbr.rel (!%p13_p3) target bundleno = 4 (0x4), region = 73 }
  0xb4   :  { %281 = vsyncpa [#allocation3], 1 }
  0xb5   :  { %283 = vsyncpa [#allocation3 + $0x1], 1 }

</bundles_post_ra>
